<compile_context>
chip_gen: v7x
topology: tpu7x:2x2x1
jax: 0.10.0
libtpu: 0.0.40
codegen_flags: <defaults>
</compile_context>

<pallas_src>
import jax
import jax.numpy as jnp
from jax.experimental import pallas as pl
from jax.experimental.pallas import tpu as pltpu


def _round_up(n, m):
    return ((n + m - 1) // m) * m


def _mlp_kernel(x_ref, w1_ref, b1_ref, w2_ref, b2_ref, w3_ref, b3_ref, o_ref):
    # Layer 1: (TB, D) @ (D, 64) on the MXU (bf16 inputs, f32 accumulation).
    h1 = jnp.dot(x_ref[...], w1_ref[...], preferred_element_type=jnp.float32)
    h1 = jnp.maximum(h1 + b1_ref[...], 0.0)
    # Layer 2: (TB, 64) @ (64, 32) on the MXU.
    h2 = jnp.dot(h1.astype(w2_ref.dtype), w2_ref[...],
                 preferred_element_type=jnp.float32)
    h2 = jnp.maximum(h2 + b2_ref[...], 0.0)
    # Layer 3 (N=1): VPU multiply + lane reduction; w3 is a (1, 32) row.
    out = jnp.sum(h2 * w3_ref[...], axis=-1, keepdims=True) + b3_ref[...]
    # Output kept as a (TB, 1) column; writeback bytes are ~1/16 of input bytes
    # so the masked-store cost is secondary (would switch to a lane-dense
    # (1, TB) row layout only if the vst slot showed up in profiles).
    o_ref[...] = out.astype(o_ref.dtype)


def crop_demand_forward(x, params, *, block_batch=1024,
                        compute_dtype=jnp.bfloat16):
    """Fused forward pass of CropDemandModel.

    x: (B, input_size) float32
    params: dict with w1 (D,64), b1 (1,64), w2 (64,32), b2 (1,32),
            w3 (32,1), b3 (1,1)  -- all float32
    returns: (B, 1) float32
    """
    B, D = x.shape
    H1 = params["w1"].shape[1]
    H2 = params["w2"].shape[1]

    # Batch tile: multiple of 8 (sublane), capped at block_batch.
    TB = min(block_batch, _round_up(B, 8))
    TB = _round_up(TB, 8)
    Bp = _round_up(B, TB)
    num_tiles = Bp // TB

    # Cast the matmul operands to bf16 at the boundary (halves HBM bytes for x,
    # the dominant transfer); accumulation stays f32 inside the kernel.
    xc = x.astype(compute_dtype)
    if Bp != B:
        xc = jnp.pad(xc, ((0, Bp - B), (0, 0)))
    w1 = params["w1"].astype(compute_dtype)
    w2 = params["w2"].astype(compute_dtype)
    b1 = params["b1"].astype(jnp.float32)
    b2 = params["b2"].astype(jnp.float32)
    w3_row = params["w3"].reshape(1, H2).astype(jnp.float32)  # (1, 32)
    b3 = params["b3"].astype(jnp.float32)                      # (1, 1)

    const = lambda i: (0, 0)  # weights/biases stay resident in VMEM

    out = pl.pallas_call(
        _mlp_kernel,
        out_shape=jax.ShapeDtypeStruct((Bp, 1), jnp.float32),
        grid=(num_tiles,),
        in_specs=[
            pl.BlockSpec((TB, D), lambda i: (i, 0)),   # x tile (pipelined)
            pl.BlockSpec((D, H1), const),              # w1
            pl.BlockSpec((1, H1), const),              # b1
            pl.BlockSpec((H1, H2), const),             # w2
            pl.BlockSpec((1, H2), const),              # b2
            pl.BlockSpec((1, H2), const),              # w3 as a row
            pl.BlockSpec((1, 1), const),               # b3
        ],
        out_specs=pl.BlockSpec((TB, 1), lambda i: (i, 0)),
        compiler_params=pltpu.CompilerParams(
            dimension_semantics=("parallel",)),
    )(xc, w1, b1, w2, b2, w3_row, b3)

    return out[:B]


def init_params(key, input_size):
    """Deterministic parameter init (PyTorch Linear-style uniform ranges)."""
    ks = jax.random.split(key, 6)

    def linear(kw, kb, fan_in, fan_out):
        bound = 1.0 / jnp.sqrt(jnp.float32(fan_in))
        # Stored as (in, out) = PyTorch weight transposed.
        w = jax.random.uniform(kw, (fan_in, fan_out), jnp.float32, -bound, bound)
        b = jax.random.uniform(kb, (1, fan_out), jnp.float32, -bound, bound)
        return w, b

    w1, b1 = linear(ks[0], ks[1], input_size, 64)
    w2, b2 = linear(ks[2], ks[3], 64, 32)
    w3, b3 = linear(ks[4], ks[5], 32, 1)
    return {"w1": w1, "b1": b1, "w2": w2, "b2": b2, "w3": w3, "b3": b3}


def reference_forward(x, p, compute_dtype=jnp.bfloat16):
    """Pure-JAX reference using the same bf16-in / f32-accumulate recipe."""
    xc = x.astype(compute_dtype)
    h1 = jnp.dot(xc, p["w1"].astype(compute_dtype),
                 preferred_element_type=jnp.float32)
    h1 = jnp.maximum(h1 + p["b1"], 0.0)
    h2 = jnp.dot(h1.astype(compute_dtype), p["w2"].astype(compute_dtype),
                 preferred_element_type=jnp.float32)
    h2 = jnp.maximum(h2 + p["b2"], 0.0)
    w3_row = p["w3"].reshape(1, -1)
    return jnp.sum(h2 * w3_row, axis=-1, keepdims=True) + p["b3"]


if __name__ == "__main__":
    key = jax.random.PRNGKey(0)
    k_x, k_p, k_x2 = jax.random.split(key, 3)

    batch = 8
    input_size = 16  # number of crop-demand features
    x = jax.random.normal(k_x, (batch, input_size), jnp.float32)
    params = init_params(k_p, input_size)

    # Small batch (single tile).
    out = jax.block_until_ready(crop_demand_forward(x, params))
    ref = reference_forward(x, params)
    assert out.shape == (batch, 1)
    assert jnp.allclose(out, ref, atol=1e-3, rtol=1e-3), "mismatch vs reference"

    # Non-divisible batch exercising the multi-tile grid + tail padding path.
    batch2 = 100
    x2 = jax.random.normal(k_x2, (batch2, input_size), jnp.float32)
    out2 = jax.block_until_ready(
        crop_demand_forward(x2, params, block_batch=64))
    ref2 = reference_forward(x2, params)
    assert out2.shape == (batch2, 1)
    assert jnp.allclose(out2, ref2, atol=1e-3, rtol=1e-3), "mismatch (tiled)"

    print("KERNEL_OK")
</pallas_src>

<mosaic_0001>
module attributes {stable_mosaic.version = 11 : i64} {
  func.func @_mlp_kernel(%arg0: i32, %arg1: memref<8x16xbf16, #tpu.memory_space<vmem>>, %arg2: memref<16x64xbf16, #tpu.memory_space<vmem>>, %arg3: memref<1x64xf32, #tpu.memory_space<vmem>>, %arg4: memref<64x32xbf16, #tpu.memory_space<vmem>>, %arg5: memref<1x32xf32, #tpu.memory_space<vmem>>, %arg6: memref<1x32xf32, #tpu.memory_space<vmem>>, %arg7: memref<1x1xf32, #tpu.memory_space<vmem>>, %arg8: memref<8x1xf32, #tpu.memory_space<vmem>>) attributes {dimension_semantics = [#tpu.dimension_semantics<parallel>], iteration_bounds = array<i64: 1>, scalar_prefetch = 0 : i64, scratch_operands = 0 : i64, tpu.core_type = #tpu.core_type<tc>, window_params = [{transform_indices = @transform_0, window_bounds = array<i64: 8, 16>}, {pipeline_mode = #tpu.pipeline_mode<synchronous>, transform_indices = @transform_1, window_bounds = array<i64: 16, 64>}, {pipeline_mode = #tpu.pipeline_mode<synchronous>, transform_indices = @transform_2, window_bounds = array<i64: 1, 64>}, {pipeline_mode = #tpu.pipeline_mode<synchronous>, transform_indices = @transform_3, window_bounds = array<i64: 64, 32>}, {pipeline_mode = #tpu.pipeline_mode<synchronous>, transform_indices = @transform_4, window_bounds = array<i64: 1, 32>}, {pipeline_mode = #tpu.pipeline_mode<synchronous>, transform_indices = @transform_5, window_bounds = array<i64: 1, 32>}, {pipeline_mode = #tpu.pipeline_mode<synchronous>, transform_indices = @transform_6, window_bounds = array<i64: 1, 1>}, {transform_indices = @transform_7, window_bounds = array<i64: 8, 1>}]} {
    %c0 = arith.constant 0 : index
    %c0_0 = arith.constant 0 : index
    %0 = vector.load %arg1[%c0, %c0_0] : memref<8x16xbf16, #tpu.memory_space<vmem>>, vector<8x16xbf16>
    %c0_1 = arith.constant 0 : index
    %c0_2 = arith.constant 0 : index
    %1 = vector.load %arg2[%c0_1, %c0_2] : memref<16x64xbf16, #tpu.memory_space<vmem>>, vector<16x64xbf16>
    %cst = arith.constant dense<0.000000e+00> : vector<8x64xf32>
    %2 = tpu.matmul %0, %1, %cst {dimension_numbers = #tpu.dot_dimension_numbers<[1], [0], [0], [1], [0, 0, 1, 1], [], []>} : vector<8x16xbf16>, vector<16x64xbf16>, vector<8x64xf32> -> vector<8x64xf32>
    %c0_3 = arith.constant 0 : index
    %c0_4 = arith.constant 0 : index
    %3 = vector.load %arg3[%c0_3, %c0_4] : memref<1x64xf32, #tpu.memory_space<vmem>>, vector<1x64xf32>
    %4 = vector.broadcast %3 : vector<1x64xf32> to vector<8x64xf32>
    %5 = arith.addf %2, %4 : vector<8x64xf32>
    %cst_5 = arith.constant 0.000000e+00 : f32
    %6 = vector.broadcast %cst_5 : f32 to vector<8x64xf32>
    %7 = arith.maximumf %5, %6 : vector<8x64xf32>
    %8 = arith.truncf %7 : vector<8x64xf32> to vector<8x64xbf16>
    %c0_6 = arith.constant 0 : index
    %c0_7 = arith.constant 0 : index
    %9 = vector.load %arg4[%c0_6, %c0_7] : memref<64x32xbf16, #tpu.memory_space<vmem>>, vector<64x32xbf16>
    %cst_8 = arith.constant dense<0.000000e+00> : vector<8x32xf32>
    %10 = tpu.matmul %8, %9, %cst_8 {dimension_numbers = #tpu.dot_dimension_numbers<[1], [0], [0], [1], [0, 0, 1, 1], [], []>} : vector<8x64xbf16>, vector<64x32xbf16>, vector<8x32xf32> -> vector<8x32xf32>
    %c0_9 = arith.constant 0 : index
    %c0_10 = arith.constant 0 : index
    %11 = vector.load %arg5[%c0_9, %c0_10] : memref<1x32xf32, #tpu.memory_space<vmem>>, vector<1x32xf32>
    %12 = vector.broadcast %11 : vector<1x32xf32> to vector<8x32xf32>
    %13 = arith.addf %10, %12 : vector<8x32xf32>
    %cst_11 = arith.constant 0.000000e+00 : f32
    %14 = vector.broadcast %cst_11 : f32 to vector<8x32xf32>
    %15 = arith.maximumf %13, %14 : vector<8x32xf32>
    %c0_12 = arith.constant 0 : index
    %c0_13 = arith.constant 0 : index
    %16 = vector.load %arg6[%c0_12, %c0_13] : memref<1x32xf32, #tpu.memory_space<vmem>>, vector<1x32xf32>
    %17 = vector.broadcast %16 : vector<1x32xf32> to vector<8x32xf32>
    %18 = arith.mulf %15, %17 : vector<8x32xf32>
    %cst_14 = arith.constant dense<0.000000e+00> : vector<8xf32>
    %19 = vector.multi_reduction <add>, %18, %cst_14 [1] : vector<8x32xf32> to vector<8xf32>
    %20 = vector.shape_cast %19 : vector<8xf32> to vector<8x1xf32>
    %c0_15 = arith.constant 0 : index
    %c0_16 = arith.constant 0 : index
    %21 = vector.load %arg7[%c0_15, %c0_16] : memref<1x1xf32, #tpu.memory_space<vmem>>, vector<1x1xf32>
    %22 = vector.broadcast %21 : vector<1x1xf32> to vector<8x1xf32>
    %23 = arith.addf %20, %22 : vector<8x1xf32>
    %c0_17 = arith.constant 0 : index
    %c0_18 = arith.constant 0 : index
    %24 = vector.load %arg8[%c0_17, %c0_18] : memref<8x1xf32, #tpu.memory_space<vmem>>, vector<8x1xf32>
    tpu.vector_store %arg8[%c0_17, %c0_18], %23 {strides = array<i32>} : memref<8x1xf32, #tpu.memory_space<vmem>>, vector<8x1xf32>,
    return
  }
  func.func @transform_0(%arg0: i32) -> (i32, i32) {
    %c0_i32 = arith.constant 0 : i32
    %c0_i32_0 = arith.constant 0 : i32
    return %arg0, %c0_i32 : i32, i32
  }
  func.func @transform_1(%arg0: i32) -> (i32, i32) {
    %c0_i32 = arith.constant 0 : i32
    %c0_i32_0 = arith.constant 0 : i32
    %c0_i32_1 = arith.constant 0 : i32
    return %c0_i32, %c0_i32_0 : i32, i32
  }
  func.func @transform_2(%arg0: i32) -> (i32, i32) {
    %c0_i32 = arith.constant 0 : i32
    %c0_i32_0 = arith.constant 0 : i32
    %c0_i32_1 = arith.constant 0 : i32
    return %c0_i32, %c0_i32_0 : i32, i32
  }
  func.func @transform_3(%arg0: i32) -> (i32, i32) {
    %c0_i32 = arith.constant 0 : i32
    %c0_i32_0 = arith.constant 0 : i32
    %c0_i32_1 = arith.constant 0 : i32
    return %c0_i32, %c0_i32_0 : i32, i32
  }
  func.func @transform_4(%arg0: i32) -> (i32, i32) {
    %c0_i32 = arith.constant 0 : i32
    %c0_i32_0 = arith.constant 0 : i32
    %c0_i32_1 = arith.constant 0 : i32
    return %c0_i32, %c0_i32_0 : i32, i32
  }
  func.func @transform_5(%arg0: i32) -> (i32, i32) {
    %c0_i32 = arith.constant 0 : i32
    %c0_i32_0 = arith.constant 0 : i32
    %c0_i32_1 = arith.constant 0 : i32
    return %c0_i32, %c0_i32_0 : i32, i32
  }
  func.func @transform_6(%arg0: i32) -> (i32, i32) {
    %c0_i32 = arith.constant 0 : i32
    %c0_i32_0 = arith.constant 0 : i32
    %c0_i32_1 = arith.constant 0 : i32
    return %c0_i32, %c0_i32_0 : i32, i32
  }
  func.func @transform_7(%arg0: i32) -> (i32, i32) {
    %c0_i32 = arith.constant 0 : i32
    %c0_i32_0 = arith.constant 0 : i32
    return %arg0, %c0_i32 : i32, i32
  }
}

</mosaic_0001>

<bundles_post_ra>
// kernel: tpu_custom_call.1
= control target key start
LH: loop header
LB: loop body
LE: loop exit
PB: predicated region body
PF: predicated region fallthrough
CT: control target
= control target key end

     0   :  { %v244_v0 = vmov 0.0   ;;  %vm245_vm0 = vmmov 0   ;;  %vm45_vm1 = vcmask 130048   ;;  %vm130_vm2 = vcmask 523264   ;;  %s319_s1 = inlined_call_operand.vmem [shape: bf16[16,64], index: 1, kind: input, shape index: {}]   ;;  %s320_s0 = inlined_call_operand.vmem [shape: bf16[8,16], index: 0, kind: input, shape index: {}]   ;;  %s321_s3 = inlined_call_operand.vmem [shape: bf16[64,32], index: 3, kind: input, shape index: {}]   ;;  %s322_s2 = inlined_call_operand.vmem [shape: f32[1,64], index: 2, kind: input, shape index: {}]   ;;  %s323_s6 = inlined_call_operand.<no memory space> [shape: f32[1,1], index: 6, kind: input, shape index: {}]   ;;  %s324_s4 = inlined_call_operand.vmem [shape: f32[1,32], index: 4, kind: input, shape index: {}]   ;;  %s325_s5 = inlined_call_operand.vmem [shape: f32[1,32], index: 5, kind: input, shape index: {}]   ;;  %s326_s7 = inlined_call_operand.vmem [shape: f32[8,1], index: 7, kind: output, shape index: {}]  }
   0x1   :  { %219 = vmatprep.subr.bf16.mxu0 %v244_v0  ;;  %v239_v1 = vld [vmem:[%s319_s1] sm:$0xff]   ;;  %221 = vmatprep.mubr.msk.bf16.mxu0 %vm245_vm0, %v244_v0  ;;  %v241_v4 = vld [vmem:[%s321_s3 + $0x8] sm:$0xff]   ;;  %v242_v5 = vld [vmem:[%s321_s3 + $0x10] sm:$0xff]   ;;  %v12_v15 = vstv %s323_s6  ;;  %vm183_vm3 = vcmask 261120   ;;  %vm195_vm4 = vcmask 7168  }
   0x2   :  { %v29_v2 = vld [vmem:[%s320_s0] sm:$0xf]  ;;  %225 = vmatprep.subr.bf16.mxu1 %v244_v0  ;;  %233 = vmatprep.mubr.msk.bf16.mxu1 %vm245_vm0, %v244_v0  ;;  %v243_v6 = vld [vmem:[%s321_s3 + $0x18] sm:$0xff]   ;;  %13 = vst [vmem:[#allocation2] sm:$0x1] %v12_v15 }
   0x3   :  { %220 = vmatpush3.bf16.msra.mxu0 %v239_v1  ;;  %v240_v3 = vld [vmem:[%s321_s3] sm:$0xff]  }
   0x4   :  { %226 = vmatpush3.bf16.msra.mxu1 %v240_v3  ;;  %v201_v7 = vld [vmem:[%s322_s2] ss:$0 sm:$0xff] }
   0x5   :  { %227 = vmatprep.subr.bf16.mxu1 %v244_v0  ;;  %v204_v16 = vld [vmem:[%s324_s4] ss:$0 sm:$0xff] }
   0x6   :  { %222 = vmatmul.mubr.msk.bf16.vlgmr.msra.gmra.mrb[0].mxu0 %vm45_vm1, %v29_v2  ;;  %v210_v21 = vld [vmem:[%s325_s5] ss:$0 sm:$0xff] }
   0x8   :  { %228 = vmatpush3.bf16.msra.mxu1 %v241_v4 }
   0x9   :  { %229 = vmatprep.subr.bf16.mxu1 %v244_v0  ;;  %v211_v26 = vld [vmem:[#allocation2] ss:$0 sm:$0xff] }
   0xc   :  { %230 = vmatpush3.bf16.msra.mxu1 %v242_v5 }
   0xd   :  { %231 = vmatprep.subr.bf16.mxu1 %v244_v0 }
  0x10   :  { %232 = vmatpush3.bf16.msra.mxu1 %v243_v6 }
  0xd9   :  { %v83_v8 = vpop.f32.mrb[0].mxu0 }
  0xda   :  { %v84_v9 = vadd.f32 %v201_v7, %v83_v8  ;;  %v223_v10 = vpop.f32.mrb[1].mxu0 }
  0xdb   :  { %v86_v11 = vpop.f32.mrb[2].mxu0 }
  0xdc   :  { %v89_v12 = vmax.f32 %v84_v9, 0.0  ;;  %v224_v13 = vpop.f32.mrb[3].mxu0 }
  0xde   :  { %v90_v14 = vpack.c.bf16 %v89_v12, %v89_v12 }
  0xe0   :  { %234 = vmatmul.mubr.msk.bf16.vlgmr.msra.gmra.mrb[0].mxu1 %vm130_vm2, %v90_v14 }
 0x1b3   :  { %v168_v17 = vpop.f32.mrb[0].mxu1 }
 0x1b4   :  { %v169_v18 = vadd.f32 %v204_v16, %v168_v17  ;;  %v235_v19 = vpop.f32.mrb[1].mxu1 }
 0x1b5   :  { %v171_v20 = vpop.f32.mrb[2].mxu1 }
 0x1b6   :  { %v174_v22 = vmax.f32 %v169_v18, 0.0  ;;  %v236_v23 = vpop.f32.mrb[3].mxu1 }
 0x1b8   :  { %v182_v24 = vmul.f32 %v210_v21, %v174_v22 }
 0x1ba   :  { %v184_v25 = vsel %vm183_vm3, %v182_v24, 0.0 }
 0x1bb   :  { %185 = vadd.xlane.f32.xlu0 %v184_v25 }
 0x248   :  { %v186_v27 = vpop.xlane.xlu0 %185 }
 0x249   :  { %v194_v28 = vadd.f32 %v211_v26, %v186_v27 }
 0x24b   :  { %196 = vst.msk [vmem:[%s326_s7] sm:$0xff] %vm195_vm4, %v194_v28 }

</bundles_post_ra>
